<compile_context>
chip_gen: v7x
topology: tpu7x:2x2x1
jax: 0.10.0
libtpu: 0.0.40
codegen_flags: <defaults>
</compile_context>

<pallas_src>
import functools

import jax
import jax.numpy as jnp
from jax.experimental import pallas as pl
from jax.experimental.pallas import tpu as pltpu

LANE = 128


def ensemble_kernel(x_ref, w_ref, b_ref, o_ref, *, inv_spatial):
    """x_ref: (TN, C, S)  w_ref: (C, Kp)  b_ref: (1, Kp)  o_ref: (TN, Kp)."""
    # Global average pool per batch row: lane-axis reduce, O(TN*C*S) VALU/XLU
    # work (no redundant MXU MACs, no O(N^2*S) mask materialization).
    pooled = jnp.sum(x_ref[...], axis=-1) * inv_spatial          # (TN, C)
    # Single pre-averaged head == mean over ensemble members (heads are linear).
    o_ref[...] = (jnp.dot(pooled, w_ref[...],
                          preferred_element_type=jnp.float32)
                  + b_ref[...])


def ensemble_forward(x, weights, biases, *, target_block_bytes=12 << 20):
    """x: (N, C, H, W) f32; weights: (M, C, K); biases: (M, K) -> (N, K)."""
    N, C, H, W = x.shape
    M, _, K = weights.shape
    S = H * W
    Kp = ((K + LANE - 1) // LANE) * LANE          # lane-dense output width

    # Free, contiguous reshape — no wrapper-side transpose of x.
    x3 = x.astype(jnp.float32).reshape(N, C, S)

    # Linearity: mean_m(pooled @ W_m + b_m) == pooled @ mean_m(W_m) + mean_m(b_m).
    w_avg = jnp.pad(jnp.mean(weights.astype(jnp.float32), axis=0),
                    ((0, 0), (0, Kp - K)))                        # (C, Kp)
    b_avg = jnp.pad(jnp.mean(biases.astype(jnp.float32), axis=0),
                    (0, Kp - K)).reshape(1, Kp)                   # (1, Kp)

    # Batch tile size: big enough to amortize per-step overhead, small enough
    # that a double-buffered x tile fits v7x's 64 MiB VMEM.  TN is a multiple
    # of 8 when it does not cover the whole batch (sublane-dense output tile).
    per_row_bytes = C * S * 4
    rows = max(1, target_block_bytes // per_row_bytes)
    if rows >= N:
        TN = N
    else:
        TN = min(max(8, (rows // 8) * 8), N)
        if TN < N and TN % 8 != 0:   # only possible for tiny N; fall back
            TN = N
    grid = (pl.cdiv(N, TN),)

    x_block_bytes = TN * per_row_bytes
    aux_bytes = 2 * (C * Kp * 4 + Kp * 4 + TN * Kp * 4)
    vmem_limit = int(min(48 << 20,
                         max(32 << 20, 2 * x_block_bytes + aux_bytes + (4 << 20))))

    out = pl.pallas_call(
        functools.partial(ensemble_kernel, inv_spatial=1.0 / S),
        out_shape=jax.ShapeDtypeStruct((N, Kp), jnp.float32),
        grid_spec=pltpu.PrefetchScalarGridSpec(
            num_scalar_prefetch=0,
            grid=grid,
            in_specs=[
                pl.BlockSpec((TN, C, S), lambda i: (i, 0, 0)),   # tiled over batch
                pl.BlockSpec((C, Kp), lambda i: (0, 0)),         # resident weights
                pl.BlockSpec((1, Kp), lambda i: (0, 0)),         # resident bias
            ],
            out_specs=pl.BlockSpec((TN, Kp), lambda i: (i, 0)),
        ),
        compiler_params=pltpu.CompilerParams(
            dimension_semantics=("parallel",),
            vmem_limit_bytes=vmem_limit,
        ),
    )(x3, w_avg, b_avg)
    return out[:, :K]


def reference_forward(x, weights, biases):
    N, C, H, W = x.shape
    pooled = jnp.mean(x.reshape(N, C, H * W), axis=-1)            # (N, C)
    per_model = jnp.einsum("nc,mck->mnk", pooled, weights) + biases[:, None, :]
    return jnp.mean(per_model, axis=0)                            # (N, K)


if __name__ == "__main__":
    # small shapes consistent with the forward: classifier ensemble over images
    N, C, H, W = 2, 4, 16, 16      # input images, NCHW
    K = 10                         # number of classes
    GOOGLENET_COUNT = 2            # len(googlenet_list)
    RESNET_COUNT = 1               # len(resnet_list)
    M = GOOGLENET_COUNT + RESNET_COUNT

    key = jax.random.PRNGKey(0)
    kx, kw, kb = jax.random.split(key, 3)
    x = jax.random.normal(kx, (N, C, H, W), dtype=jnp.float32)
    weights = 0.1 * jax.random.normal(kw, (M, C, K), dtype=jnp.float32)
    biases = 0.01 * jax.random.normal(kb, (M, K), dtype=jnp.float32)

    y = ensemble_forward(x, weights, biases)
    y = jax.block_until_ready(y)

    y_ref = reference_forward(x, weights, biases)
    assert y.shape == (N, K)
    assert jnp.allclose(y, y_ref, atol=1e-5, rtol=1e-5)

    print("KERNEL_OK")
</pallas_src>

<mosaic_0001>
module attributes {stable_mosaic.version = 11 : i64} {
  func.func @ensemble_kernel(%arg0: i32, %arg1: memref<2x4x256xf32, #tpu.memory_space<vmem>>, %arg2: memref<4x128xf32, #tpu.memory_space<vmem>>, %arg3: memref<1x128xf32, #tpu.memory_space<vmem>>, %arg4: memref<2x128xf32, #tpu.memory_space<vmem>>) attributes {dimension_semantics = [#tpu.dimension_semantics<parallel>], iteration_bounds = array<i64: 1>, scalar_prefetch = 0 : i64, scratch_operands = 0 : i64, tpu.core_type = #tpu.core_type<tc>, window_params = [{transform_indices = @transform_0, window_bounds = array<i64: 2, 4, 256>}, {pipeline_mode = #tpu.pipeline_mode<synchronous>, transform_indices = @transform_1, window_bounds = array<i64: 4, 128>}, {pipeline_mode = #tpu.pipeline_mode<synchronous>, transform_indices = @transform_2, window_bounds = array<i64: 1, 128>}, {transform_indices = @transform_3, window_bounds = array<i64: 2, 128>}]} {
    %c0 = arith.constant 0 : index
    %c0_0 = arith.constant 0 : index
    %c0_1 = arith.constant 0 : index
    %0 = vector.load %arg1[%c0, %c0_0, %c0_1] : memref<2x4x256xf32, #tpu.memory_space<vmem>>, vector<2x4x256xf32>
    %cst = arith.constant dense<0.000000e+00> : vector<2x4xf32>
    %1 = vector.multi_reduction <add>, %0, %cst [2] : vector<2x4x256xf32> to vector<2x4xf32>
    %cst_2 = arith.constant 3.906250e-03 : f32
    %2 = vector.broadcast %cst_2 : f32 to vector<2x4xf32>
    %3 = arith.mulf %1, %2 : vector<2x4xf32>
    %c0_3 = arith.constant 0 : index
    %c0_4 = arith.constant 0 : index
    %4 = vector.load %arg2[%c0_3, %c0_4] : memref<4x128xf32, #tpu.memory_space<vmem>>, vector<4x128xf32>
    %cst_5 = arith.constant dense<0.000000e+00> : vector<2x128xf32>
    %5 = tpu.matmul %3, %4, %cst_5 {dimension_numbers = #tpu.dot_dimension_numbers<[1], [0], [0], [1], [0, 0, 1, 1], [], []>} : vector<2x4xf32>, vector<4x128xf32>, vector<2x128xf32> -> vector<2x128xf32>
    %c0_6 = arith.constant 0 : index
    %c0_7 = arith.constant 0 : index
    %6 = vector.load %arg3[%c0_6, %c0_7] : memref<1x128xf32, #tpu.memory_space<vmem>>, vector<1x128xf32>
    %7 = vector.broadcast %6 : vector<1x128xf32> to vector<2x128xf32>
    %8 = arith.addf %5, %7 : vector<2x128xf32>
    %c0_8 = arith.constant 0 : index
    %c0_9 = arith.constant 0 : index
    %9 = vector.load %arg4[%c0_8, %c0_9] : memref<2x128xf32, #tpu.memory_space<vmem>>, vector<2x128xf32>
    tpu.vector_store %arg4[%c0_8, %c0_9], %8 {strides = array<i32>} : memref<2x128xf32, #tpu.memory_space<vmem>>, vector<2x128xf32>,
    return
  }
  func.func @transform_0(%arg0: i32) -> (i32, i32, i32) {
    %c0_i32 = arith.constant 0 : i32
    %c0_i32_0 = arith.constant 0 : i32
    %c0_i32_1 = arith.constant 0 : i32
    return %arg0, %c0_i32, %c0_i32_0 : i32, i32, i32
  }
  func.func @transform_1(%arg0: i32) -> (i32, i32) {
    %c0_i32 = arith.constant 0 : i32
    %c0_i32_0 = arith.constant 0 : i32
    %c0_i32_1 = arith.constant 0 : i32
    return %c0_i32, %c0_i32_0 : i32, i32
  }
  func.func @transform_2(%arg0: i32) -> (i32, i32) {
    %c0_i32 = arith.constant 0 : i32
    %c0_i32_0 = arith.constant 0 : i32
    %c0_i32_1 = arith.constant 0 : i32
    return %c0_i32, %c0_i32_0 : i32, i32
  }
  func.func @transform_3(%arg0: i32) -> (i32, i32) {
    %c0_i32 = arith.constant 0 : i32
    %c0_i32_0 = arith.constant 0 : i32
    return %arg0, %c0_i32 : i32, i32
  }
}

</mosaic_0001>

<bundles_post_ra>
// kernel: tpu_custom_call.1
= control target key start
LH: loop header
LB: loop body
LE: loop exit
PB: predicated region body
PF: predicated region fallthrough
CT: control target
= control target key end

     0   :  { %8 = vsyncpa [#allocation3], 0  ;;  %s339_s0 = inlined_call_operand.hbm [shape: f32[2,4,256], index: 0, kind: input, shape index: {}]   ;;  %s340_s1 = inlined_call_operand.hbm [shape: f32[4,128], index: 1, kind: input, shape index: {}]   ;;  %s341_s2 = inlined_call_operand.vmem [shape: f32[1,128], index: 2, kind: input, shape index: {}]   ;;  %s342_s3 = inlined_call_operand.hbm [shape: f32[2,128], index: 3, kind: output, shape index: {}]  }
   0x1   :  { %9 = vsyncpa [#allocation6], 0 }
   0x2   :  { %10 = vsyncpa [#allocation4], 0  ;;  %s268_s12 = smov [#allocation2]   ;;  %s196_s16 = scalar_lea.hbm %s339_s0, 256 }
   0x3   :  { %s16_s13 = sshll.u32 %s268_s12, 4  ;;  %p197_p0 = scmp.ne.s32.totalorder %s339_s0, %s196_s16  ;;  %s17_s13 = int_to_ptr.vmem [resolvable:$true] %s16_s13 }
   0x4   :  { %p200_p1 = scmp.lt.u32.totalorder %s196_s16, %s339_s0 }
   0x6   :  { %p202_p2 = pnand %p200_p1, %p197_p0 }
   0x8   :  { %205 = shalt.err (!%p202_p2)
}
   0x9   :  { %s206_s21 = scalar_lea.vmem %s17_s13, 256  ;;  %p211_p4 = scmp.lt.s32.totalorder %s17_s13, %s17_s13 }
   0xa   :  { %p207_p3 = scmp.ne.s32.totalorder %s17_s13, %s206_s21  ;;  %p212_p5 = scmp.lt.s32.totalorder %s206_s21, %s206_s21 }
   0xc   :  { %p213_p6 = por %p212_p5, %p211_p4 }
   0xe   :  { %p214_p7 = pnand %p213_p6, %p207_p3 }
  0x10   :  { %217 = shalt.err (!%p214_p7)
}
  0x11   :  { %s269_s22 = smov 128   ;;  %s270_s23 = smov 8  }
  0x12   :  { %22 = dma.hbm_to_vmem [thread:$0]  %s339_s0, 256, %s17_s13, [#allocation3], %s269_s22, %s269_s22, %s270_s23  }
  0x13   :  { %s271_s26 = smov [#allocation5]   ;;  %s218_s30 = scalar_lea.hbm %s340_s1, 64 }
  0x14   :  { %s29_s27 = sshll.u32 %s271_s26, 4  ;;  %p219_p8 = scmp.ne.s32.totalorder %s340_s1, %s218_s30  ;;  %s30_s27 = int_to_ptr.vmem [resolvable:$true] %s29_s27 }
  0x15   :  { %p222_p9 = scmp.lt.u32.totalorder %s218_s30, %s340_s1 }
  0x17   :  { %p224_p10 = pnand %p222_p9, %p219_p8 }
  0x19   :  { %227 = shalt.err (!%p224_p10)
}
  0x1a   :  { %s228_s8 = scalar_lea.vmem %s30_s27, 64  ;;  %p233_p12 = scmp.lt.s32.totalorder %s30_s27, %s30_s27 }
  0x1b   :  { %p229_p11 = scmp.ne.s32.totalorder %s30_s27, %s228_s8  ;;  %p234_p13 = scmp.lt.s32.totalorder %s228_s8, %s228_s8 }
  0x1d   :  { %p235_p0 = por %p234_p13, %p233_p12 }
  0x1f   :  { %p236_p1 = pnand %p235_p0, %p229_p11 }
  0x21   :  { %239 = shalt.err (!%p236_p1)
}
  0x22   :  { %32 = dma.hbm_to_vmem [thread:$0]  %s340_s1, 64, %s30_s27, [#allocation6]  }
  0x23   :  { %262 = dma.done.wait [#allocation3], 256  }
  0x24   :  { %263 = vsyncadd [#allocation3], 4294967040 }
  0x25   :  { %264 = dma.done.wait [#allocation6], 64  }
  0x26   :  { %265 = vsyncadd [#allocation6], 4294967232  ;;  %vm49_vm0 = vcmask 1043456   ;;  %v41_v0 = vld [vmem:[#allocation2] sm:$0xff]  ;;  %v42_v1 = vld [vmem:[#allocation2 + $0x8] sm:$0xff]  ;;  %v272_v11 = vmov 0.0   ;;  %v72_v12 = vlaneseq }
  0x27   :  { %v45_v2 = vcombine.high %v41_v0, %v41_v0  ;;  %v50_v3 = vsel %vm49_vm0, %v41_v0, 0.0  ;;  %v46_v4 = vcombine.high %v42_v1, %v42_v1  ;;  %v55_v6 = vsel %vm49_vm0, %v42_v1, 0.0  ;;  %v62_v10 = vld [vmem:[#allocation5] sm:$0xf]  ;;  %182 = vmatprep.subr.mxu0 %v272_v11  ;;  %v177_v23 = vld [vmem:[%s341_s2] ss:$0 sm:$0xff] }
  0x28   :  { %vm273_vm1 = vmmov 0   ;;  %183 = vmatpush3.msk.msra.mxu0 %vm49_vm0, %v62_v10  ;;  %v73_v13 = vand.u32 127, %v72_v12  ;;  %v75_v14 = vshrl.u32 %v72_v12, 7  ;;  %vm82_vm2 = vcmask 1041409   ;;  %s274_s11 = smov [#allocation7]  }
  0x29   :  { %v51_v5 = vsel %vm49_vm0, %v45_v2, 0.0  ;;  %v56_v7 = vsel %vm49_vm0, %v46_v4, 0.0  ;;  %184 = vmatprep.mubr.msk.f32.mxu0 %vm273_vm1, %v272_v11  ;;  %vm84_vm3 = vcmask 31744   ;;  %s167_s12 = sshll.u32 %s274_s11, 4  ;;  %s168_s12 = int_to_ptr.vmem [resolvable:$true] %s167_s12 }
  0x2a   :  { %v52_v8 = vadd.f32 %v51_v5, %v50_v3  ;;  %v57_v9 = vadd.f32 %v56_v7, %v55_v6  ;;  %v76_v16 = vsub.s32 %v73_v13, %v75_v14  ;;  %s240_s13 = scalar_lea.vmem %s168_s12, 32  ;;  %p245_p3 = scmp.lt.s32.totalorder %s168_s12, %s168_s12 }
  0x2b   :  { %p241_p2 = scmp.ne.s32.totalorder %s168_s12, %s240_s13  ;;  %p246_p4 = scmp.lt.s32.totalorder %s240_s13, %s240_s13 }
  0x2c   :  { %53 = vadd.xlane.f32.xlu0 %v52_v8 }
  0x2d   :  { %p247_p5 = por %p246_p4, %p245_p3 }
  0x2f   :  { %p248_p6 = pnand %p247_p5, %p241_p2 }
  0x30   :  { %58 = vadd.xlane.f32.xlu0 %v57_v9 }
  0xb9   :  { %v54_v15 = vpop.xlane.xlu0 %53 }
  0xba   :  { %v60_v17 = vmul.f32 0.00390625, %v54_v15 }
  0xbc   :  { %v77_v20 = vrot.slane %v60_v17, %v76_v16 }
  0xbd   :  { %v59_v18 = vpop.xlane.xlu0 %58 }
  0xbe   :  { %v61_v19 = vmul.f32 0.00390625, %v59_v18 }
  0xc0   :  { %v81_v21 = vrot.slane %v61_v19, %v76_v16 }
  0xc2   :  { %v83_v22 = vsel %vm82_vm2, %v81_v21, %v77_v20 }
  0xc3   :  { %185 = vmatmul.mubr.msk.f32.vlgmr.msra.gmra.mrb[0].mxu0 %vm84_vm3, %v83_v22 }
 0x196   :  { %v156_v24 = vpop.f32.mrb[0].mxu0 }
 0x197   :  { %v157_v25 = vadd.f32 %v177_v23, %v156_v24  ;;  %v186_v26 = vpop.f32.mrb[1].mxu0 }
 0x199   :  { %160 = vst [vmem:[#allocation7] sm:$0x3] %v157_v25 }
 0x19a   :  { %251 = shalt.err (!%p248_p6)
}
 0x19b   :  { %s252_s16 = scalar_lea.hbm %s342_s3, 32 }
 0x19c   :  { %p253_p7 = scmp.ne.s32.totalorder %s342_s3, %s252_s16  ;;  %p256_p8 = scmp.lt.u32.totalorder %s252_s16, %s342_s3 }
 0x19e   :  { %p258_p9 = pnand %p256_p8, %p253_p7 }
 0x1a0   :  { %261 = shalt.err (!%p258_p9)
}
 0x1a1   :  { %170 = dma.vmem_to_hbm [thread:$0]  %s168_s12, 32, %s342_s3, [#allocation4]  }
 0x1a2   :  { %266 = dma.done.wait [#allocation4], 32  }
 0x1a3   :  { %267 = vsyncadd [#allocation4], 4294967264 }
 0x1a4   :  { %174 = vsyncpa [#allocation3], 1 }
 0x1a5   :  { %175 = vsyncpa [#allocation6], 1 }
 0x1a6   :  { %176 = vsyncpa [#allocation4], 1 }

</bundles_post_ra>
